<compile_context>
chip_gen: v7x
topology: tpu7x:2x2x1
jax: 0.10.0
libtpu: 0.0.40
codegen_flags: <defaults>
</compile_context>

<pallas_src>
import functools

import jax
import jax.numpy as jnp
from jax import lax
from jax.experimental import pallas as pl
from jax.experimental.pallas import tpu as pltpu

LANES = 128


def _cdiv(a, b):
    return (a + b - 1) // b


def _round_up(x, m):
    return ((x + m - 1) // m) * m


def _packed_layout(state_size, action_size, fcs1_units, fc2_units):
    """Row offsets of each section inside the packed [rows, 128] buffer."""
    S, A, H1, H2 = state_size, action_size, fcs1_units, fc2_units
    assert H1 <= LANES and H2 <= LANES, "hidden widths must fit in 128 lanes"
    r_w1 = 0                              # rows [r_w1 : r_w1+S)   W1  (state -> lanes [0:H1))
    r_b1 = _round_up(max(S, 8), 8)        # row  r_b1              b1  (lanes [0:H1))
    r_w2 = r_b1 + 8                       # rows [r_w2 : r_w2+128) W2s (xs lanes -> lanes [0:H2))
    r_w2a = r_w2 + LANES                  # rows [r_w2a: r_w2a+A)  W2a (action -> lanes [0:H2))
    r_b2 = r_w2a + _round_up(max(A, 8), 8)  # row r_b2             b2
    r_w3 = r_b2 + 8                       # row  r_w3              w3  (rows r_w3+1..+7 stay zero)
    r_b3 = r_w3 + 8                       # row  r_b3              b3  (lane 0)
    total = r_b3 + 8                      # multiple of 8
    return r_w1, r_b1, r_w2, r_w2a, r_b2, r_w3, r_b3, total


def _choose_tile(batch, block_b):
    """Rows of the batch processed per grid step.

    * multiple of 16 (bf16 sublane packing), >= 16;
    * capped near ceil(B/2) so there are >= 2 grid steps whenever possible
      (v7x: two TensorCores split the "parallel" batch axis);
    * snapped up to a multiple of 128 once large so the lane-dense output
      row is a whole number of vregs (unmasked stores).
    """
    tb = _round_up(max(_cdiv(batch, 2), 16), 16)
    tb = min(tb, max(16, _round_up(block_b, 16)))
    if tb >= 128:
        tb = _round_up(tb, 128)
    return tb


def _make_kernel(state_size, action_size, layout):
    S, A = state_size, action_size
    r_w1, r_b1, r_w2, r_w2a, r_b2, r_w3, r_b3, _ = layout
    f32 = jnp.float32
    # fc3 as a transposed-RHS matmul (w3 @ h^T): lane-dense [.., tb] result.
    NT_DIMS = (((1,), (1,)), ((), ()))

    def kernel(s_ref, a_ref, w_ref, out_ref):
        mxu_dt = w_ref.dtype                             # f32 or bf16 operands

        s = s_ref[...]                                   # [tb, S]
        a = a_ref[...]                                   # [tb, A]
        w1 = w_ref[r_w1:r_w1 + S, :]                     # [S, 128]
        b1 = w_ref[r_b1:r_b1 + 1, :].astype(f32)         # [1, 128]
        w2 = w_ref[r_w2:r_w2 + LANES, :]                 # [128, 128]
        w2a = w_ref[r_w2a:r_w2a + A, :]                  # [A, 128]
        b2 = w_ref[r_b2:r_b2 + 1, :].astype(f32)         # [1, 128]
        w3 = w_ref[r_w3:r_w3 + 8, :]                     # [8, 128] (rows 1..7 zero)
        b3 = w_ref[r_b3:r_b3 + 1, :].astype(f32)[:, 0:1]  # [1, 1]

        # Layer 1: xs = relu(state @ W1 + b1).  Lanes >= H1 have zero weight
        # columns and zero bias, so they stay exactly 0 after the relu.
        xs = jnp.maximum(jnp.dot(s, w1, preferred_element_type=f32) + b1, 0.0)

        # Layer 2: torch.cat folded away -> xs @ W2s + action @ W2a + b2.
        h = jnp.maximum(
            jnp.dot(xs.astype(mxu_dt), w2, preferred_element_type=f32)
            + jnp.dot(a, w2a, preferred_element_type=f32)
            + b2, 0.0)

        # Layer 3 (output width 1), emitted lane-dense: q_row = w3 @ h^T.
        q8 = lax.dot_general(w3, h.astype(mxu_dt), NT_DIMS,
                             preferred_element_type=f32)  # [8, tb], rows 1..7 = 0
        q = q8[0:1, :] + b3                               # [1, tb]
        out_ref[...] = q[None]                            # (1, 1, tb) block

    return kernel


@functools.partial(jax.jit,
                   static_argnames=("fcs1_units", "fc2_units", "block_b"))
def critic_forward(state, action, packed_w, *, fcs1_units=24, fc2_units=48,
                   block_b=2048):
    """Pallas implementation of Critic.forward.

    state:    [B, state_size]   (same dtype as packed_w for zero-copy)
    action:   [B, action_size]
    packed_w: [rows, 128]       from pack_critic_params (dtype = MXU dtype)
    returns   [B, 1] float32
    """
    B, S = state.shape
    A = action.shape[1]
    layout = _packed_layout(S, A, fcs1_units, fc2_units)
    total_rows = layout[-1]
    assert packed_w.shape == (total_rows, LANES)

    # MXU operand dtype comes from packed_w; when the caller already supplies
    # matching activations these casts are no-ops (no wrapper HBM traffic).
    state = state.astype(packed_w.dtype)
    action = action.astype(packed_w.dtype)

    tb = _choose_tile(B, block_b)
    nb = _cdiv(B, tb)

    out = pl.pallas_call(
        _make_kernel(S, A, layout),
        out_shape=jax.ShapeDtypeStruct((nb, 1, tb), jnp.float32),
        grid_spec=pltpu.PrefetchScalarGridSpec(
            num_scalar_prefetch=0,
            grid=(nb,),
            in_specs=[
                pl.BlockSpec((tb, S), lambda i: (i, 0)),
                pl.BlockSpec((tb, A), lambda i: (i, 0)),
                # Constant index_map -> packed weights DMA'd once, resident.
                pl.BlockSpec((total_rows, LANES), lambda i: (0, 0)),
            ],
            out_specs=pl.BlockSpec((1, 1, tb), lambda i: (i, 0, 0)),
        ),
        compiler_params=pltpu.CompilerParams(
            dimension_semantics=("parallel",)),
    )(state, action, packed_w)

    # (nb, 1, tb) is row-major batch order; drop the ragged tail.
    return out.reshape(nb * tb, 1)[:B]


def init_critic_params(key, state_size, action_size,
                       fcs1_units=24, fc2_units=48):
    """Parameter init mirroring the PyTorch module's shapes/semantics.

    PyTorch Linear weight is [out, in]; we store the transpose [in, out].
    fc2's weight is split into the slice acting on xs and the slice acting
    on action, matching cat([xs, action], dim=1).
    """
    ks = jax.random.split(key, 6)

    # hidden_init uses weight.size()[0] == out_features (quirk preserved).
    lim1 = 1.0 / jnp.sqrt(jnp.float32(fcs1_units))
    lim2 = 1.0 / jnp.sqrt(jnp.float32(fc2_units))
    lim3 = 0.003

    w1_t = jax.random.uniform(ks[0], (state_size, fcs1_units),
                              jnp.float32, -lim1, lim1)
    b1 = jax.random.uniform(ks[1], (1, fcs1_units), jnp.float32,
                            -1.0 / jnp.sqrt(jnp.float32(state_size)),
                            1.0 / jnp.sqrt(jnp.float32(state_size)))

    w2_t = jax.random.uniform(ks[2], (fcs1_units + action_size, fc2_units),
                              jnp.float32, -lim2, lim2)
    w2s_t = w2_t[:fcs1_units, :]
    w2a_t = w2_t[fcs1_units:, :]
    fan2 = jnp.float32(fcs1_units + action_size)
    b2 = jax.random.uniform(ks[3], (1, fc2_units), jnp.float32,
                            -1.0 / jnp.sqrt(fan2), 1.0 / jnp.sqrt(fan2))

    w3_t = jax.random.uniform(ks[4], (fc2_units, 1), jnp.float32, -lim3, lim3)
    b3 = jax.random.uniform(ks[5], (1, 1), jnp.float32,
                            -1.0 / jnp.sqrt(jnp.float32(fc2_units)),
                            1.0 / jnp.sqrt(jnp.float32(fc2_units)))

    return (w1_t, b1, w2s_t, w2a_t, b2, w3_t, b3)


def pack_critic_params(params, state_size, action_size,
                       fcs1_units=24, fc2_units=48, dtype=jnp.float32):
    """Pack all weights/biases into one zero-padded [rows, 128] buffer.

    ZERO-PADDING INVARIANT (the kernel depends on it): every element not
    explicitly written below must remain zero — bias lanes >= H1/H2, weight
    columns >= H1/H2, rows r_w3+1..r_w3+7, and all alignment-padding rows.
    """
    w1_t, b1, w2s_t, w2a_t, b2, w3_t, b3 = params
    S, A, H1, H2 = state_size, action_size, fcs1_units, fc2_units
    (r_w1, r_b1, r_w2, r_w2a, r_b2, r_w3, r_b3,
     total) = _packed_layout(S, A, H1, H2)

    buf = jnp.zeros((total, LANES), jnp.float32)
    buf = buf.at[r_w1:r_w1 + S, 0:H1].set(w1_t)
    buf = buf.at[r_b1, 0:H1].set(b1.reshape(H1))
    buf = buf.at[r_w2:r_w2 + H1, 0:H2].set(w2s_t)
    buf = buf.at[r_w2a:r_w2a + A, 0:H2].set(w2a_t)
    buf = buf.at[r_b2, 0:H2].set(b2.reshape(H2))
    buf = buf.at[r_w3, 0:H2].set(w3_t.reshape(H2))
    buf = buf.at[r_b3, 0].set(b3.reshape(()))
    return buf.astype(dtype)


def critic_forward_ref(state, action, params):
    """Pure-JAX f32 reference for correctness checking."""
    w1_t, b1, w2s_t, w2a_t, b2, w3_t, b3 = params
    xs = jax.nn.relu(state @ w1_t + b1)
    h = jax.nn.relu(xs @ w2s_t + action @ w2a_t + b2)
    return h @ w3_t + b3


if __name__ == "__main__":
    S, A = 16, 4
    H1, H2 = 24, 48

    key = jax.random.PRNGKey(0)
    k_state, k_action, k_params = jax.random.split(key, 3)
    params = init_critic_params(k_params, S, A, H1, H2)
    packed_f32 = pack_critic_params(params, S, A, H1, H2)

    # 1) Small batch (single grid step), f32 end-to-end.
    B = 8
    state = jax.random.normal(k_state, (B, S), jnp.float32)
    action = jax.random.normal(k_action, (B, A), jnp.float32)
    q = critic_forward(state, action, packed_f32,
                       fcs1_units=H1, fc2_units=H2)
    jax.block_until_ready(q)
    q_ref = critic_forward_ref(state, action, params)
    assert q.shape == (B, 1)
    assert jnp.allclose(q, q_ref, atol=1e-4, rtol=1e-4)

    # 2) Larger, non-multiple batch: multi-step grid + ragged last block,
    #    packed weights resident across steps.
    B2 = 300
    state2 = jax.random.normal(jax.random.PRNGKey(1), (B2, S), jnp.float32)
    action2 = jax.random.normal(jax.random.PRNGKey(2), (B2, A), jnp.float32)
    q2 = critic_forward(state2, action2, packed_f32,
                        fcs1_units=H1, fc2_units=H2, block_b=128)
    jax.block_until_ready(q2)
    q2_ref = critic_forward_ref(state2, action2, params)
    assert q2.shape == (B2, 1)
    assert jnp.allclose(q2, q2_ref, atol=1e-4, rtol=1e-4)

    # 3) bf16-operand path (v5e/v6e bandwidth + MXU lever): bf16 activations
    #    and packed weights, f32 accumulation/VPU math -> loose tolerance.
    packed_bf16 = pack_critic_params(params, S, A, H1, H2,
                                     dtype=jnp.bfloat16)
    B3 = 64
    state3 = jax.random.normal(jax.random.PRNGKey(3), (B3, S), jnp.float32)
    action3 = jax.random.normal(jax.random.PRNGKey(4), (B3, A), jnp.float32)
    q3 = critic_forward(state3.astype(jnp.bfloat16),
                        action3.astype(jnp.bfloat16), packed_bf16,
                        fcs1_units=H1, fc2_units=H2)
    jax.block_until_ready(q3)
    q3_ref = critic_forward_ref(state3, action3, params)
    assert q3.shape == (B3, 1)
    assert jnp.allclose(q3, q3_ref, atol=2e-2, rtol=2e-2)

    print("KERNEL_OK")
</pallas_src>

<mosaic_0001>
module attributes {stable_mosaic.version = 11 : i64} {
  func.func @kernel(%arg0: i32, %arg1: memref<16x16xf32, #tpu.memory_space<vmem>>, %arg2: memref<16x4xf32, #tpu.memory_space<vmem>>, %arg3: memref<184x128xf32, #tpu.memory_space<vmem>>, %arg4: memref<1x1x16xf32, #tpu.memory_space<vmem>>) attributes {dimension_semantics = [#tpu.dimension_semantics<parallel>], iteration_bounds = array<i64: 1>, scalar_prefetch = 0 : i64, scratch_operands = 0 : i64, tpu.core_type = #tpu.core_type<tc>, window_params = [{transform_indices = @transform_0, window_bounds = array<i64: 16, 16>}, {transform_indices = @transform_1, window_bounds = array<i64: 16, 4>}, {pipeline_mode = #tpu.pipeline_mode<synchronous>, transform_indices = @transform_2, window_bounds = array<i64: 184, 128>}, {transform_indices = @transform_3, window_bounds = array<i64: 1, 1, 16>}]} {
    %c0 = arith.constant 0 : index
    %c0_0 = arith.constant 0 : index
    %0 = vector.load %arg1[%c0, %c0_0] : memref<16x16xf32, #tpu.memory_space<vmem>>, vector<16x16xf32>
    %c0_1 = arith.constant 0 : index
    %c0_2 = arith.constant 0 : index
    %1 = vector.load %arg2[%c0_1, %c0_2] : memref<16x4xf32, #tpu.memory_space<vmem>>, vector<16x4xf32>
    %c0_3 = arith.constant 0 : index
    %c0_4 = arith.constant 0 : index
    %2 = vector.load %arg3[%c0_3, %c0_4] : memref<184x128xf32, #tpu.memory_space<vmem>>, vector<16x128xf32>
    %c16 = arith.constant 16 : index
    %c0_5 = arith.constant 0 : index
    %3 = vector.load %arg3[%c16, %c0_5] : memref<184x128xf32, #tpu.memory_space<vmem>>, vector<1x128xf32>
    %c24 = arith.constant 24 : index
    %c0_6 = arith.constant 0 : index
    %4 = vector.load %arg3[%c24, %c0_6] : memref<184x128xf32, #tpu.memory_space<vmem>>, vector<128x128xf32>
    %c152 = arith.constant 152 : index
    %c0_7 = arith.constant 0 : index
    %5 = vector.load %arg3[%c152, %c0_7] : memref<184x128xf32, #tpu.memory_space<vmem>>, vector<4x128xf32>
    %c160 = arith.constant 160 : index
    %c0_8 = arith.constant 0 : index
    %6 = vector.load %arg3[%c160, %c0_8] : memref<184x128xf32, #tpu.memory_space<vmem>>, vector<1x128xf32>
    %c168 = arith.constant 168 : index
    %c0_9 = arith.constant 0 : index
    %7 = vector.load %arg3[%c168, %c0_9] : memref<184x128xf32, #tpu.memory_space<vmem>>, vector<8x128xf32>
    %c176 = arith.constant 176 : index
    %c0_10 = arith.constant 0 : index
    %8 = vector.load %arg3[%c176, %c0_10] : memref<184x128xf32, #tpu.memory_space<vmem>>, vector<1x128xf32>
    %9 = vector.extract_strided_slice %8 {offsets = [0, 0], sizes = [1, 1], strides = [1, 1]} : vector<1x128xf32> to vector<1x1xf32>
    %cst = arith.constant dense<0.000000e+00> : vector<16x128xf32>
    %10 = tpu.matmul %0, %2, %cst {dimension_numbers = #tpu.dot_dimension_numbers<[1], [0], [0], [1], [0, 0, 1, 1], [], []>} : vector<16x16xf32>, vector<16x128xf32>, vector<16x128xf32> -> vector<16x128xf32>
    %11 = vector.broadcast %3 : vector<1x128xf32> to vector<16x128xf32>
    %12 = arith.addf %10, %11 : vector<16x128xf32>
    %cst_11 = arith.constant 0.000000e+00 : f32
    %13 = vector.broadcast %cst_11 : f32 to vector<16x128xf32>
    %14 = arith.maximumf %12, %13 : vector<16x128xf32>
    %cst_12 = arith.constant dense<0.000000e+00> : vector<16x128xf32>
    %15 = tpu.matmul %14, %4, %cst_12 {dimension_numbers = #tpu.dot_dimension_numbers<[1], [0], [0], [1], [0, 0, 1, 1], [], []>} : vector<16x128xf32>, vector<128x128xf32>, vector<16x128xf32> -> vector<16x128xf32>
    %cst_13 = arith.constant dense<0.000000e+00> : vector<16x128xf32>
    %16 = tpu.matmul %1, %5, %cst_13 {dimension_numbers = #tpu.dot_dimension_numbers<[1], [0], [0], [1], [0, 0, 1, 1], [], []>} : vector<16x4xf32>, vector<4x128xf32>, vector<16x128xf32> -> vector<16x128xf32>
    %17 = arith.addf %15, %16 : vector<16x128xf32>
    %18 = vector.broadcast %6 : vector<1x128xf32> to vector<16x128xf32>
    %19 = arith.addf %17, %18 : vector<16x128xf32>
    %cst_14 = arith.constant 0.000000e+00 : f32
    %20 = vector.broadcast %cst_14 : f32 to vector<16x128xf32>
    %21 = arith.maximumf %19, %20 : vector<16x128xf32>
    %cst_15 = arith.constant dense<0.000000e+00> : vector<8x16xf32>
    %22 = tpu.matmul %7, %21, %cst_15 {dimension_numbers = #tpu.dot_dimension_numbers<[1], [1], [0], [0], [0, 0, 1, 0], [], []>} : vector<8x128xf32>, vector<16x128xf32>, vector<8x16xf32> -> vector<8x16xf32>
    %23 = vector.extract_strided_slice %22 {offsets = [0, 0], sizes = [1, 16], strides = [1, 1]} : vector<8x16xf32> to vector<1x16xf32>
    %24 = vector.broadcast %9 : vector<1x1xf32> to vector<1x16xf32>
    %25 = arith.addf %23, %24 : vector<1x16xf32>
    %26 = vector.shape_cast %25 : vector<1x16xf32> to vector<1x1x16xf32>
    %c0_16 = arith.constant 0 : index
    %c0_17 = arith.constant 0 : index
    %c0_18 = arith.constant 0 : index
    %27 = vector.load %arg4[%c0_16, %c0_17, %c0_18] : memref<1x1x16xf32, #tpu.memory_space<vmem>>, vector<1x1x16xf32>
    tpu.vector_store %arg4[%c0_16, %c0_17, %c0_18], %26 {strides = array<i32>} : memref<1x1x16xf32, #tpu.memory_space<vmem>>, vector<1x1x16xf32>,
    return
  }
  func.func @transform_0(%arg0: i32) -> (i32, i32) {
    %c0_i32 = arith.constant 0 : i32
    %c0_i32_0 = arith.constant 0 : i32
    return %arg0, %c0_i32 : i32, i32
  }
  func.func @transform_1(%arg0: i32) -> (i32, i32) {
    %c0_i32 = arith.constant 0 : i32
    %c0_i32_0 = arith.constant 0 : i32
    return %arg0, %c0_i32 : i32, i32
  }
  func.func @transform_2(%arg0: i32) -> (i32, i32) {
    %c0_i32 = arith.constant 0 : i32
    %c0_i32_0 = arith.constant 0 : i32
    %c0_i32_1 = arith.constant 0 : i32
    return %c0_i32, %c0_i32_0 : i32, i32
  }
  func.func @transform_3(%arg0: i32) -> (i32, i32, i32) {
    %c0_i32 = arith.constant 0 : i32
    %c0_i32_0 = arith.constant 0 : i32
    %c0_i32_1 = arith.constant 0 : i32
    return %arg0, %c0_i32, %c0_i32_0 : i32, i32, i32
  }
}

</mosaic_0001>

<bundles_post_ra>
// kernel: critic_forward.1
= control target key start
LH: loop header
LB: loop body
LE: loop exit
PB: predicated region body
PF: predicated region fallthrough
CT: control target
= control target key end

     0   :  { %8 = vsyncpa [#allocation3], 0  ;;  %s557_s12 = smov [#allocation2]   ;;  %s613_s0 = inlined_call_operand.vmem [shape: f32[8,16], index: 0, kind: input, shape index: {}]   ;;  %s614_s1 = inlined_call_operand.vmem [shape: f32[8,4], index: 1, kind: input, shape index: {}]   ;;  %s615_s2 = inlined_call_operand.hbm [shape: f32[184,128], index: 2, kind: input, shape index: {}]   ;;  %s616_s3 = inlined_call_operand.vmem [shape: f32[1,1,16], index: 3, kind: output, shape index: {}]  }
   0x1   :  { %s18_s13 = sshll.u32 %s557_s12, 4  ;;  %s533_s16 = scalar_lea.hbm %s615_s2, 2944  ;;  %s19_s13 = int_to_ptr.vmem [resolvable:$true] %s18_s13 }
   0x2   :  { %p534_p0 = scmp.ne.s32.totalorder %s615_s2, %s533_s16  ;;  %p537_p1 = scmp.lt.u32.totalorder %s533_s16, %s615_s2 }
   0x4   :  { %p539_p2 = pnand %p537_p1, %p534_p0 }
   0x6   :  { %542 = shalt.err (!%p539_p2)
}
   0x7   :  { %s543_s21 = scalar_lea.vmem %s19_s13, 2944  ;;  %p548_p4 = scmp.lt.s32.totalorder %s19_s13, %s19_s13 }
   0x8   :  { %p544_p3 = scmp.ne.s32.totalorder %s19_s13, %s543_s21  ;;  %p549_p5 = scmp.lt.s32.totalorder %s543_s21, %s543_s21 }
   0xa   :  { %p550_p6 = por %p549_p5, %p548_p4 }
   0xc   :  { %p551_p7 = pnand %p550_p6, %p544_p3 }
   0xe   :  { %554 = shalt.err (!%p551_p7)
}
   0xf   :  { %s558_s22 = smov 128   ;;  %s559_s23 = smov 8  }
  0x10   :  { %24 = dma.hbm_to_vmem [thread:$0]  %s615_s2, 2944, %s19_s13, [#allocation3], %s558_s22, %s558_s22, %s559_s23  }
  0x11   :  { %555 = dma.done.wait [#allocation3], 2944  }
  0x12   :  { %556 = vsyncadd [#allocation3], 4294964352  ;;  %vm59_vm0 = vcmask 130048   ;;  %v32_v0 = vld [vmem:[#allocation2] sm:$0xff]  ;;  %v33_v1 = vld [vmem:[#allocation2 + $0x8] sm:$0xff]  ;;  %vm150_vm1 = vcmask 1043456  }
  0x13   :  { %v28_v2 = vld [vmem:[%s613_s0] sm:$0xff]  ;;  %v484_v3 = vpack.c.bf16 %v33_v1, %v32_v0  ;;  %v35_v4 = vld [vmem:[#allocation2 + $0x18] sm:$0xff]  ;;  %v37_v7 = vld [vmem:[#allocation2 + $0x28] sm:$0xff]  ;;  %vm143_vm2 = vcmask 31744   ;;  %v560_v41 = vmov 0.0|0.0   ;;  %vm561_vm3 = vmmov 0  }
  0x14   :  { %434 = vmatprep.mubr.msk.f32.mxu0 %vm59_vm0, %v28_v2  ;;  %v36_v5 = vld [vmem:[#allocation2 + $0x20] sm:$0xff]  ;;  %v38_v8 = vld [vmem:[#allocation2 + $0x30] sm:$0xff]  ;;  %v39_v10 = vld [vmem:[#allocation2 + $0x38] sm:$0xff]  ;;  %v562_v42 = vmov 0.0   ;;  %v563_v44 = vmov 0   ;;  %vm388_vm4 = vcmask 122880  }
  0x15   :  { %v488_v6 = vpack.c.bf16 %v36_v5, %v35_v4  ;;  %485 = vmatprep.subr.bf16.mxu0 %v484_v3  ;;  %v492_v9 = vpack.c.bf16 %v38_v8, %v37_v7  ;;  %v40_v11 = vld [vmem:[#allocation2 + $0x40] sm:$0xff]  ;;  %v29_v12 = vld [vmem:[%s613_s0 + $0x8] sm:$0xff]  ;;  %v42_v15 = vld [vmem:[#allocation2 + $0x50] sm:$0xff]  ;;  %532 = vset.pattern.permute.xlu0 %v563_v44 }
  0x16   :  { %487 = vmatpush3.bf16.msra.mxu0 %v484_v3  ;;  %v496_v13 = vpack.c.bf16 %v40_v11, %v39_v10  ;;  %v41_v14 = vld [vmem:[#allocation2 + $0x48] sm:$0xff]  ;;  %v43_v17 = vld [vmem:[#allocation2 + $0x58] sm:$0xff]  ;;  %v44_v18 = vld [vmem:[#allocation2 + $0x60] sm:$0xff] }
  0x17   :  { %489 = vmatprep.subr.bf16.mxu1 %v488_v6  ;;  %v500_v16 = vpack.c.bf16 %v42_v15, %v41_v14  ;;  %v504_v19 = vpack.c.bf16 %v44_v18, %v43_v17  ;;  %v45_v20 = vld [vmem:[#allocation2 + $0x68] sm:$0xff]  ;;  %v46_v21 = vld [vmem:[#allocation2 + $0x70] sm:$0xff]  ;;  %v47_v23 = vld [vmem:[#allocation2 + $0x78] sm:$0xff] }
  0x18   :  { %491 = vmatpush3.bf16.msra.mxu1 %v488_v6  ;;  %v508_v22 = vpack.c.bf16 %v46_v21, %v45_v20  ;;  %v48_v24 = vld [vmem:[#allocation2 + $0x80] sm:$0xff]  ;;  %v49_v26 = vld [vmem:[#allocation2 + $0x88] sm:$0xff]  ;;  %v50_v27 = vld [vmem:[#allocation2 + $0x90] sm:$0xff] }
  0x19   :  { %493 = vmatprep.subr.bf16.mxu1 %v492_v9  ;;  %435 = vmatmul.mubr.msk.f32.vlgmr.msra.gmra.mrb[0].mxu0 %vm59_vm0, %v29_v12  ;;  %v512_v25 = vpack.c.bf16 %v48_v24, %v47_v23  ;;  %v516_v28 = vpack.c.bf16 %v50_v27, %v49_v26  ;;  %v51_v29 = vld [vmem:[#allocation2 + $0x98] sm:$0xf]  ;;  %v30_v30 = vld [vmem:[%s614_s1] sm:$0xff]  ;;  %v31_v31 = vld [vmem:[%s614_s1 + $0x8] sm:$0xff] }
  0x1a   :  { %437 = vmatprep.subr.msk.mxu0 %vm150_vm1, %v51_v29  ;;  %439 = vmatprep.mubr.msk.f32.mxu0 %vm143_vm2, %v30_v30  ;;  %v395_v32 = vld [vmem:[#allocation2 + $0x10] ss:$0 sm:$0xff]  ;;  %v401_v45 = vld [vmem:[#allocation2 + $0xa0] ss:$0 sm:$0xff]  ;;  %v53_v55 = vld [vmem:[#allocation2 + $0xa8] sm:$0xff] }
  0x1b   :  { %438 = vmatpush3.msk.msra.mxu0 %vm150_vm1, %v51_v29  ;;  %v54_v43 = vld [vmem:[#allocation2 + $0xb0] sm:$0x1] }
  0x1c   :  { %495 = vmatpush3.bf16.msra.mxu1 %v492_v9  ;;  %520 = vmatprep.subr.bf16.mxu0 %v560_v41 }
  0x1d   :  { %497 = vmatprep.subr.bf16.mxu1 %v496_v13  ;;  %440 = vmatmul.mubr.msk.f32.vlgmr.msra.gmra.mrb[2].mxu0 %vm143_vm2, %v31_v31 }
  0x1e   :  { %481 = vmatprep.mubr.msk.f32.mxu0 %vm561_vm3, %v562_v42  ;;  %384 = vperm.xlu0 %532, %v54_v43  }
  0x20   :  { %499 = vmatpush3.bf16.msra.mxu1 %v496_v13 }
  0x21   :  { %501 = vmatprep.subr.bf16.mxu1 %v500_v16 }
  0x24   :  { %503 = vmatpush3.bf16.msra.mxu1 %v500_v16 }
  0x25   :  { %505 = vmatprep.subr.bf16.mxu1 %v504_v19 }
  0x28   :  { %507 = vmatpush3.bf16.msra.mxu1 %v504_v19 }
  0x29   :  { %509 = vmatprep.subr.bf16.mxu1 %v508_v22 }
  0x2c   :  { %511 = vmatpush3.bf16.msra.mxu1 %v508_v22 }
  0x2d   :  { %513 = vmatprep.subr.bf16.mxu1 %v512_v25 }
  0x30   :  { %515 = vmatpush3.bf16.msra.mxu1 %v512_v25 }
  0x31   :  { %517 = vmatprep.subr.bf16.mxu1 %v516_v28 }
  0x34   :  { %519 = vmatpush3.bf16.msra.mxu1 %v516_v28 }
  0x9d   :  { %v385_v56 = vpop.permute.xlu0 %384 }
  0xec   :  { %v436_v33 = vpop.f32.mrb[0].mxu0 }
  0xed   :  { %v138_v34 = vadd.f32 %v436_v33, %v395_v32  ;;  %v132_v35 = vpop.f32.mrb[1].mxu0 }
  0xee   :  { %v133_v36 = vadd.f32 %v395_v32, %v132_v35 }
  0xef   :  { %v142_v38 = vmax.f32 %v138_v34, 0.0 }
  0xf0   :  { %v141_v37 = vmax.f32 %v133_v36, 0.0  ;;  %v441_v39 = vpop.f32.mrb[2].mxu0 }
  0xf1   :  { %v220_v40 = vpop.f32.mrb[3].mxu0 }
  0xf2   :  { %474 = vmatprep.mubr.f32.mxu1 %v141_v37 }
  0xf3   :  { %475 = vmatmul.mubr.f32.vlgmr.msra.gmra.mrb[0].mxu1 %v142_v38 }
 0x1c6   :  { %v476_v46 = vpop.f32.mrb[0].mxu1 }
 0x1c7   :  { %v301_v47 = vadd.f32 %v476_v46, %v441_v39  ;;  %v295_v48 = vpop.f32.mrb[1].mxu1 }
 0x1c8   :  { %v296_v49 = vadd.f32 %v295_v48, %v220_v40 }
 0x1c9   :  { %v309_v50 = vadd.f32 %v401_v45, %v301_v47 }
 0x1ca   :  { %v308_v51 = vadd.f32 %v401_v45, %v296_v49 }
 0x1cb   :  { %v311_v52 = vmax.f32 %v309_v50, 0.0 }
 0x1cc   :  { %v310_v53 = vmax.f32 %v308_v51, 0.0 }
 0x1ce   :  { %v521_v54 = vpack.c.bf16 %v311_v52, %v310_v53 }
 0x1d0   :  { %522 = vmatpush3.bf16.xpose.msra.mxu0 %v521_v54 }
 0x1d7   :  { %482 = vmatmul.mubr.f32.vlgmr.msra.gmra.mrb[4].mxu0 %v53_v55 }
 0x2aa   :  { %v378_v57 = vpop.f32.mrb[4].mxu0 }
 0x2ab   :  { %v387_v58 = vadd.f32 %v385_v56, %v378_v57  ;;  %v483_v59 = vpop.f32.mrb[5].mxu0 }
 0x2ad   :  { %389 = vst.msk [vmem:[%s616_s3] sm:$0x1] %vm388_vm4, %v387_v58 }
 0x2ae   :  { %394 = vsyncpa [#allocation3], 1 }

</bundles_post_ra>
